<compile_context>
chip_gen: v7x
topology: tpu7x:2x2x1
jax: 0.10.0
libtpu: 0.0.40
codegen_flags: <defaults>
</compile_context>

<pallas_src>
import math
import numpy as np

import jax
import jax.numpy as jnp
from jax.experimental import pallas as pl
from jax.experimental.pallas import tpu as pltpu

_HIGHEST = jax.lax.Precision.HIGHEST


def _inv_timescales(channels, min_timescale=1.0, max_timescale=10000.0):
    """inv_timescales of get_positional_encoding; guarded for channels//2 <= 1."""
    num = channels // 2
    if num <= 0:
        return np.zeros((0,), np.float32)
    if num == 1:
        return np.array([min_timescale], np.float32)
    log_inc = math.log(float(max_timescale) / float(min_timescale)) / (num - 1)
    return (min_timescale
            * np.exp(np.arange(num, dtype=np.float32) * np.float32(-log_inc))
            ).astype(np.float32)


def _pos_tables(out_channels):
    """Per-output-lane tables so that
         pos[:, j] = sin(pos_r * coef_r[j] + pos_c * coef_c[j] + phase[j])
       reproduces cat([pe(pos_r, half), pe(pos_c, out - half)], -1)."""
    half = out_channels // 2
    ch_r, ch_c = half, out_channels - half
    coef_r = np.zeros((out_channels,), np.float32)
    coef_c = np.zeros((out_channels,), np.float32)
    phase = np.zeros((out_channels,), np.float32)

    inv_r = _inv_timescales(ch_r)
    inv_c = _inv_timescales(ch_c)
    nr, nc = inv_r.shape[0], inv_c.shape[0]
    # row-position half: [sin | cos | (pad -> coef=0, phase=0 -> sin(0)=0)]
    coef_r[0:nr] = inv_r
    coef_r[nr:2 * nr] = inv_r
    phase[nr:2 * nr] = np.float32(math.pi / 2.0)      # sin(x + pi/2) == cos(x)
    # col-position half
    coef_c[ch_r:ch_r + nc] = inv_c
    coef_c[ch_r + nc:ch_r + 2 * nc] = inv_c
    phase[ch_r + nc:ch_r + 2 * nc] = np.float32(math.pi / 2.0)
    return coef_r, coef_c, phase


def _round_up(a, b):
    return (a + b - 1) // b * b


def image_embedding_kernel(xg_ref, sg_ref, w_ref, b_ref, p_ref, ph_ref, m_ref,
                           o_ref):
    # Linear projection with block-diagonal (grouped) weights -> (TMg, L) on MXU.
    h = jnp.dot(xg_ref[...], w_ref[...],
                precision=_HIGHEST, preferred_element_type=jnp.float32)
    # Scaled positions + phase for every output lane; single sin pass on the EUP.
    st = jnp.dot(sg_ref[...], p_ref[...],
                 precision=_HIGHEST, preferred_element_type=jnp.float32)
    st = st + ph_ref[...]
    # Per-lane mask broadcast via a 0/1 selection matrix (exact).
    mask = jnp.dot(sg_ref[...], m_ref[...],
                   precision=_HIGHEST, preferred_element_type=jnp.float32)
    o_ref[...] = ((h + b_ref[...] + jnp.sin(st)) * mask).astype(o_ref.dtype)


def image_embedding(x, x_mask, pos_r, pos_c, w, b, out_channels,
                    target_tile_rows=512):
    """x: (B,T,Cin); x_mask,pos_r,pos_c: (B,T,1); w: (Cin,Cout); b: (Cout,)."""
    B, T, c_in = x.shape
    M = B * T
    out_dtype = x.dtype

    # ---- lane-dense grouping: pack G consecutive rows into one wide output row ----
    G = 128 // math.gcd(out_channels, 128)
    if G > 8:                   # pathological out_channels: fall back to ungrouped
        G = 1
    L = G * out_channels        # output lane width (multiple of 128 when grouped)
    kx = G * c_in               # grouped x width
    ks = 3 * G                  # grouped packed-scalar width

    m_g = _round_up(M, G) // G  # grouped rows needed
    tile_mg = max(8, min(_round_up(max(target_tile_rows // G, 1), 8),
                         _round_up(m_g, 8)))
    m_g_pad = _round_up(m_g, tile_mg)
    m_pad = m_g_pad * G

    # ---- flatten, pack pos_r/pos_c/mask into ONE operand, pad rows ----
    xf = x.reshape(M, c_in).astype(jnp.float32)
    sf = jnp.concatenate([pos_r.reshape(M, 1), pos_c.reshape(M, 1),
                          x_mask.reshape(M, 1)], axis=1).astype(jnp.float32)
    if m_pad != M:
        xf = jnp.pad(xf, ((0, m_pad - M), (0, 0)))
        sf = jnp.pad(sf, ((0, m_pad - M), (0, 0)))
    xg = xf.reshape(m_g_pad, kx)
    sg = sf.reshape(m_g_pad, ks)

    # ---- grid-invariant tables (host-side, tiny) ----
    coef_r, coef_c, phase = _pos_tables(out_channels)
    eye_g = np.eye(G, dtype=np.float32)
    p0 = np.zeros((3, out_channels), np.float32)
    p0[0], p0[1] = coef_r, coef_c                      # row 2 (mask) contributes 0
    m0 = np.zeros((3, out_channels), np.float32)
    m0[2] = 1.0
    p_mat = jnp.asarray(np.kron(eye_g, p0))            # (3G, L)
    m_sel = jnp.asarray(np.kron(eye_g, m0))            # (3G, L)
    ph_row = jnp.asarray(np.tile(phase, G)).reshape(1, L)
    b_row = jnp.tile(b.astype(jnp.float32).reshape(1, out_channels), (1, G))
    w_big = jnp.kron(jnp.eye(G, dtype=jnp.float32),
                     w.astype(jnp.float32))            # (G*Cin, L) block-diagonal

    out = pl.pallas_call(
        image_embedding_kernel,
        out_shape=jax.ShapeDtypeStruct((m_g_pad, L), out_dtype),
        grid=(m_g_pad // tile_mg,),
        in_specs=[
            pl.BlockSpec((tile_mg, kx), lambda i: (i, 0)),   # grouped x rows
            pl.BlockSpec((tile_mg, ks), lambda i: (i, 0)),   # packed pos_r/pos_c/mask
            pl.BlockSpec((kx, L), lambda i: (0, 0)),         # block-diag W
            pl.BlockSpec((1, L), lambda i: (0, 0)),          # tiled bias
            pl.BlockSpec((ks, L), lambda i: (0, 0)),         # pos coefficient matrix
            pl.BlockSpec((1, L), lambda i: (0, 0)),          # phase row
            pl.BlockSpec((ks, L), lambda i: (0, 0)),         # mask selector
        ],
        out_specs=pl.BlockSpec((tile_mg, L), lambda i: (i, 0)),
        compiler_params=pltpu.CompilerParams(
            dimension_semantics=("parallel",),
            vmem_limit_bytes=32 * 1024 * 1024),
    )(xg, sg, w_big, b_row, p_mat, ph_row, m_sel)

    out = out.reshape(m_pad, out_channels)[:M]
    return out.reshape(B, T, out_channels)


def _reference(x, x_mask, pos_r, pos_c, w, b, out_channels):
    """Pure-JAX reference mirroring the PyTorch forward."""
    def pe(position, channels):
        inv = jnp.asarray(_inv_timescales(channels)).reshape(1, 1, -1)
        st = position * inv
        sig = jnp.concatenate([jnp.sin(st), jnp.cos(st)], -1)
        pad = channels % 2
        if pad:
            sig = jnp.pad(sig, ((0, 0), (0, 0), (0, pad)))
        return sig

    half = out_channels // 2
    h = jnp.dot(x, w, precision=_HIGHEST) + b
    x_pos = jnp.concatenate([pe(pos_r, half), pe(pos_c, out_channels - half)], -1)
    return (h + x_pos) * x_mask


if __name__ == "__main__":
    B, T = 2, 8
    in_channels, out_channels = 4, 32

    key = jax.random.PRNGKey(0)
    k_x, k_w, k_b, k_m = jax.random.split(key, 4)

    x = jax.random.normal(k_x, (B, T, in_channels), dtype=jnp.float32)
    # 0/1 padding-style mask
    x_mask = (jax.random.uniform(k_m, (B, T, 1)) > 0.2).astype(jnp.float32)
    # row / column positions (flattened image-grid coordinates)
    pos_r = (jnp.arange(B * T, dtype=jnp.float32) // T).reshape(B, T, 1)
    pos_c = (jnp.arange(B * T, dtype=jnp.float32) % T).reshape(B, T, 1)

    # Deterministic Linear params (PyTorch-style uniform bound 1/sqrt(fan_in)).
    bound = 1.0 / math.sqrt(in_channels)
    w = jax.random.uniform(k_w, (in_channels, out_channels), jnp.float32,
                           minval=-bound, maxval=bound)
    b = jax.random.uniform(k_b, (out_channels,), jnp.float32,
                           minval=-bound, maxval=bound)

    out = image_embedding(x, x_mask, pos_r, pos_c, w, b, out_channels)
    out = jax.block_until_ready(out)

    ref = _reference(x, x_mask, pos_r, pos_c, w, b, out_channels)
    assert out.shape == (B, T, out_channels)
    assert jnp.allclose(out, ref, atol=1e-4, rtol=1e-4), \
        float(jnp.max(jnp.abs(out - ref)))

    print("KERNEL_OK")
</pallas_src>

<mosaic_0001>
module attributes {stable_mosaic.version = 11 : i64} {
  func.func @image_embedding_kernel(%arg0: i32, %arg1: memref<8x16xf32, #tpu.memory_space<vmem>>, %arg2: memref<8x12xf32, #tpu.memory_space<vmem>>, %arg3: memref<16x128xf32, #tpu.memory_space<vmem>>, %arg4: memref<1x128xf32, #tpu.memory_space<vmem>>, %arg5: memref<12x128xf32, #tpu.memory_space<vmem>>, %arg6: memref<1x128xf32, #tpu.memory_space<vmem>>, %arg7: memref<12x128xf32, #tpu.memory_space<vmem>>, %arg8: memref<8x128xf32, #tpu.memory_space<vmem>>) attributes {dimension_semantics = [#tpu.dimension_semantics<parallel>], iteration_bounds = array<i64: 1>, scalar_prefetch = 0 : i64, scratch_operands = 0 : i64, tpu.core_type = #tpu.core_type<tc>, window_params = [{transform_indices = @transform_0, window_bounds = array<i64: 8, 16>}, {transform_indices = @transform_1, window_bounds = array<i64: 8, 12>}, {pipeline_mode = #tpu.pipeline_mode<synchronous>, transform_indices = @transform_2, window_bounds = array<i64: 16, 128>}, {pipeline_mode = #tpu.pipeline_mode<synchronous>, transform_indices = @transform_3, window_bounds = array<i64: 1, 128>}, {pipeline_mode = #tpu.pipeline_mode<synchronous>, transform_indices = @transform_4, window_bounds = array<i64: 12, 128>}, {pipeline_mode = #tpu.pipeline_mode<synchronous>, transform_indices = @transform_5, window_bounds = array<i64: 1, 128>}, {pipeline_mode = #tpu.pipeline_mode<synchronous>, transform_indices = @transform_6, window_bounds = array<i64: 12, 128>}, {transform_indices = @transform_7, window_bounds = array<i64: 8, 128>}]} {
    %c0 = arith.constant 0 : index
    %c0_0 = arith.constant 0 : index
    %0 = vector.load %arg1[%c0, %c0_0] : memref<8x16xf32, #tpu.memory_space<vmem>>, vector<8x16xf32>
    %c0_1 = arith.constant 0 : index
    %c0_2 = arith.constant 0 : index
    %1 = vector.load %arg3[%c0_1, %c0_2] : memref<16x128xf32, #tpu.memory_space<vmem>>, vector<16x128xf32>
    %cst = arith.constant dense<0.000000e+00> : vector<8x128xf32>
    %2 = tpu.matmul %0, %1, %cst {dimension_numbers = #tpu.dot_dimension_numbers<[1], [0], [0], [1], [0, 0, 1, 1], [], []>, precision = #tpu.contract_precision<fp32>} : vector<8x16xf32>, vector<16x128xf32>, vector<8x128xf32> -> vector<8x128xf32>
    %c0_3 = arith.constant 0 : index
    %c0_4 = arith.constant 0 : index
    %3 = vector.load %arg2[%c0_3, %c0_4] : memref<8x12xf32, #tpu.memory_space<vmem>>, vector<8x12xf32>
    %c0_5 = arith.constant 0 : index
    %c0_6 = arith.constant 0 : index
    %4 = vector.load %arg5[%c0_5, %c0_6] : memref<12x128xf32, #tpu.memory_space<vmem>>, vector<12x128xf32>
    %cst_7 = arith.constant dense<0.000000e+00> : vector<8x128xf32>
    %5 = tpu.matmul %3, %4, %cst_7 {dimension_numbers = #tpu.dot_dimension_numbers<[1], [0], [0], [1], [0, 0, 1, 1], [], []>, precision = #tpu.contract_precision<fp32>} : vector<8x12xf32>, vector<12x128xf32>, vector<8x128xf32> -> vector<8x128xf32>
    %c0_8 = arith.constant 0 : index
    %c0_9 = arith.constant 0 : index
    %6 = vector.load %arg6[%c0_8, %c0_9] : memref<1x128xf32, #tpu.memory_space<vmem>>, vector<1x128xf32>
    %7 = vector.broadcast %6 : vector<1x128xf32> to vector<8x128xf32>
    %8 = arith.addf %5, %7 : vector<8x128xf32>
    %c0_10 = arith.constant 0 : index
    %c0_11 = arith.constant 0 : index
    %9 = vector.load %arg2[%c0_10, %c0_11] : memref<8x12xf32, #tpu.memory_space<vmem>>, vector<8x12xf32>
    %c0_12 = arith.constant 0 : index
    %c0_13 = arith.constant 0 : index
    %10 = vector.load %arg7[%c0_12, %c0_13] : memref<12x128xf32, #tpu.memory_space<vmem>>, vector<12x128xf32>
    %cst_14 = arith.constant dense<0.000000e+00> : vector<8x128xf32>
    %11 = tpu.matmul %9, %10, %cst_14 {dimension_numbers = #tpu.dot_dimension_numbers<[1], [0], [0], [1], [0, 0, 1, 1], [], []>, precision = #tpu.contract_precision<fp32>} : vector<8x12xf32>, vector<12x128xf32>, vector<8x128xf32> -> vector<8x128xf32>
    %c0_15 = arith.constant 0 : index
    %c0_16 = arith.constant 0 : index
    %12 = vector.load %arg4[%c0_15, %c0_16] : memref<1x128xf32, #tpu.memory_space<vmem>>, vector<1x128xf32>
    %13 = vector.broadcast %12 : vector<1x128xf32> to vector<8x128xf32>
    %14 = arith.addf %2, %13 : vector<8x128xf32>
    %15 = math.sin %8 : vector<8x128xf32>
    %16 = arith.addf %14, %15 : vector<8x128xf32>
    %17 = arith.mulf %16, %11 : vector<8x128xf32>
    %c0_17 = arith.constant 0 : index
    %c0_18 = arith.constant 0 : index
    %18 = vector.load %arg8[%c0_17, %c0_18] : memref<8x128xf32, #tpu.memory_space<vmem>>, vector<8x128xf32>
    tpu.vector_store %arg8[%c0_17, %c0_18], %17 {strides = array<i32>} : memref<8x128xf32, #tpu.memory_space<vmem>>, vector<8x128xf32>,
    return
  }
  func.func @transform_0(%arg0: i32) -> (i32, i32) {
    %c0_i32 = arith.constant 0 : i32
    %c0_i32_0 = arith.constant 0 : i32
    return %arg0, %c0_i32 : i32, i32
  }
  func.func @transform_1(%arg0: i32) -> (i32, i32) {
    %c0_i32 = arith.constant 0 : i32
    %c0_i32_0 = arith.constant 0 : i32
    return %arg0, %c0_i32 : i32, i32
  }
  func.func @transform_2(%arg0: i32) -> (i32, i32) {
    %c0_i32 = arith.constant 0 : i32
    %c0_i32_0 = arith.constant 0 : i32
    %c0_i32_1 = arith.constant 0 : i32
    return %c0_i32, %c0_i32_0 : i32, i32
  }
  func.func @transform_3(%arg0: i32) -> (i32, i32) {
    %c0_i32 = arith.constant 0 : i32
    %c0_i32_0 = arith.constant 0 : i32
    %c0_i32_1 = arith.constant 0 : i32
    return %c0_i32, %c0_i32_0 : i32, i32
  }
  func.func @transform_4(%arg0: i32) -> (i32, i32) {
    %c0_i32 = arith.constant 0 : i32
    %c0_i32_0 = arith.constant 0 : i32
    %c0_i32_1 = arith.constant 0 : i32
    return %c0_i32, %c0_i32_0 : i32, i32
  }
  func.func @transform_5(%arg0: i32) -> (i32, i32) {
    %c0_i32 = arith.constant 0 : i32
    %c0_i32_0 = arith.constant 0 : i32
    %c0_i32_1 = arith.constant 0 : i32
    return %c0_i32, %c0_i32_0 : i32, i32
  }
  func.func @transform_6(%arg0: i32) -> (i32, i32) {
    %c0_i32 = arith.constant 0 : i32
    %c0_i32_0 = arith.constant 0 : i32
    %c0_i32_1 = arith.constant 0 : i32
    return %c0_i32, %c0_i32_0 : i32, i32
  }
  func.func @transform_7(%arg0: i32) -> (i32, i32) {
    %c0_i32 = arith.constant 0 : i32
    %c0_i32_0 = arith.constant 0 : i32
    return %arg0, %c0_i32 : i32, i32
  }
}

</mosaic_0001>

<bundles_post_ra>
// kernel: tpu_custom_call.1
= control target key start
LH: loop header
LB: loop body
LE: loop exit
PB: predicated region body
PF: predicated region fallthrough
CT: control target
= control target key end

     0   :  { %12 = vsyncpa [#allocation3], 0  ;;  %s2247_s0 = inlined_call_operand.hbm [shape: f32[8,16], index: 0, kind: input, shape index: {}]   ;;  %s2248_s1 = inlined_call_operand.hbm [shape: f32[8,12], index: 1, kind: input, shape index: {}]   ;;  %s2249_s2 = inlined_call_operand.hbm [shape: f32[16,128], index: 2, kind: input, shape index: {}]   ;;  %s2250_s3 = inlined_call_operand.vmem [shape: f32[1,128], index: 3, kind: input, shape index: {}]   ;;  %s2251_s4 = inlined_call_operand.hbm [shape: f32[12,128], index: 4, kind: input, shape index: {}]   ;;  %s2252_s5 = inlined_call_operand.vmem [shape: f32[1,128], index: 5, kind: input, shape index: {}]   ;;  %s2253_s6 = inlined_call_operand.vmem [shape: f32[12,128], index: 6, kind: input, shape index: {}]   ;;  %s2254_s7 = inlined_call_operand.hbm [shape: f32[8,128], index: 7, kind: output, shape index: {}]  }
   0x1   :  { %13 = vsyncpa [#allocation6], 0 }
   0x2   :  { %14 = vsyncpa [#allocation9], 0 }
   0x3   :  { %15 = vsyncpa [#allocation4], 0  ;;  %s2019_s24 = smov [#allocation5]   ;;  %s2020_s26 = smov [#allocation2]  }
   0x4   :  { %s32_s25 = sshll.u32 %s2019_s24, 4  ;;  %s22_s27 = sshll.u32 %s2020_s26, 4  ;;  %s33_s25 = int_to_ptr.vmem [resolvable:$true] %s32_s25  ;;  %s23_s27 = int_to_ptr.vmem [resolvable:$true] %s22_s27 }
   0x5   :  { %s1901_s30 = scalar_lea.hbm %s2248_s1, 128 }
   0x6   :  { %p1902_p0 = scmp.ne.s32.totalorder %s2248_s1, %s1901_s30  ;;  %p1905_p1 = scmp.lt.u32.totalorder %s1901_s30, %s2248_s1 }
   0x8   :  { %p1907_p2 = pnand %p1905_p1, %p1902_p0 }
   0xa   :  { %1910 = shalt.err (!%p1907_p2)
}
   0xb   :  { %s1911_s12 = scalar_lea.vmem %s33_s25, 128  ;;  %p1916_p4 = scmp.lt.s32.totalorder %s33_s25, %s33_s25 }
   0xc   :  { %p1912_p3 = scmp.ne.s32.totalorder %s33_s25, %s1911_s12  ;;  %p1917_p5 = scmp.lt.s32.totalorder %s1911_s12, %s1911_s12 }
   0xe   :  { %p1918_p6 = por %p1917_p5, %p1916_p4 }
  0x10   :  { %p1919_p7 = pnand %p1918_p6, %p1912_p3 }
  0x12   :  { %1922 = shalt.err (!%p1919_p7)
}
  0x13   :  { %35 = dma.hbm_to_vmem [thread:$0]  %s2248_s1, 128, %s33_s25, [#allocation6]  }
  0x14   :  { %s1923_s17 = scalar_lea.hbm %s2247_s0, 128 }
  0x15   :  { %p1924_p8 = scmp.ne.s32.totalorder %s2247_s0, %s1923_s17  ;;  %p1927_p9 = scmp.lt.u32.totalorder %s1923_s17, %s2247_s0 }
  0x17   :  { %p1929_p10 = pnand %p1927_p9, %p1924_p8 }
  0x19   :  { %1932 = shalt.err (!%p1929_p10)
}
  0x1a   :  { %s1933_s22 = scalar_lea.vmem %s23_s27, 128  ;;  %p1938_p12 = scmp.lt.s32.totalorder %s23_s27, %s23_s27 }
  0x1b   :  { %p1934_p11 = scmp.ne.s32.totalorder %s23_s27, %s1933_s22  ;;  %p1939_p13 = scmp.lt.s32.totalorder %s1933_s22, %s1933_s22 }
  0x1d   :  { %p1940_p0 = por %p1939_p13, %p1938_p12 }
  0x1f   :  { %p1941_p1 = pnand %p1940_p0, %p1934_p11 }
  0x21   :  { %1944 = shalt.err (!%p1941_p1)
}
  0x22   :  { %25 = dma.hbm_to_vmem [thread:$0]  %s2247_s0, 128, %s23_s27, [#allocation3]  }
  0x23   :  { %s2021_s24 = smov [#allocation7]   ;;  %s1945_s29 = scalar_lea.hbm %s2249_s2, 256 }
  0x24   :  { %s41_s25 = sshll.u32 %s2021_s24, 4  ;;  %p1946_p2 = scmp.ne.s32.totalorder %s2249_s2, %s1945_s29  ;;  %s42_s25 = int_to_ptr.vmem [resolvable:$true] %s41_s25 }
  0x25   :  { %p1949_p3 = scmp.lt.u32.totalorder %s1945_s29, %s2249_s2 }
  0x27   :  { %p1951_p4 = pnand %p1949_p3, %p1946_p2 }
  0x29   :  { %1954 = shalt.err (!%p1951_p4)
}
  0x2a   :  { %s1955_s11 = scalar_lea.vmem %s42_s25, 256  ;;  %p1960_p6 = scmp.lt.s32.totalorder %s42_s25, %s42_s25 }
  0x2b   :  { %p1956_p5 = scmp.ne.s32.totalorder %s42_s25, %s1955_s11  ;;  %p1961_p7 = scmp.lt.s32.totalorder %s1955_s11, %s1955_s11 }
  0x2d   :  { %p1962_p8 = por %p1961_p7, %p1960_p6 }
  0x2f   :  { %p1963_p9 = pnand %p1962_p8, %p1956_p5 }
  0x31   :  { %1966 = shalt.err (!%p1963_p9)
}
  0x32   :  { %s2022_s0 = smov 128   ;;  %s2023_s27 = smov 8  }
  0x33   :  { %47 = dma.hbm_to_vmem [thread:$0]  %s2249_s2, 256, %s42_s25, [#allocation6], %s2022_s0, %s2022_s0, %s2023_s27  }
  0x34   :  { %s2024_s14 = smov [#allocation8]   ;;  %s1967_s18 = scalar_lea.hbm %s2251_s4, 256 }
  0x35   :  { %s55_s15 = sshll.u32 %s2024_s14, 4  ;;  %p1968_p10 = scmp.ne.s32.totalorder %s2251_s4, %s1967_s18  ;;  %s56_s15 = int_to_ptr.vmem [resolvable:$true] %s55_s15 }
  0x36   :  { %p1971_p11 = scmp.lt.u32.totalorder %s1967_s18, %s2251_s4 }
  0x38   :  { %p1973_p12 = pnand %p1971_p11, %p1968_p10 }
  0x3a   :  { %1976 = shalt.err (!%p1973_p12)
}
  0x3b   :  { %s1977_s1 = scalar_lea.vmem %s56_s15, 256  ;;  %p1982_p0 = scmp.lt.s32.totalorder %s56_s15, %s56_s15 }
  0x3c   :  { %p1978_p13 = scmp.ne.s32.totalorder %s56_s15, %s1977_s1  ;;  %p1983_p1 = scmp.lt.s32.totalorder %s1977_s1, %s1977_s1 }
  0x3e   :  { %p1984_p2 = por %p1983_p1, %p1982_p0 }
  0x40   :  { %p1985_p3 = pnand %p1984_p2, %p1978_p13 }
  0x42   :  { %1988 = shalt.err (!%p1985_p3)
}
  0x43   :  { %61 = dma.hbm_to_vmem [thread:$0]  %s2251_s4, 256, %s56_s15, [#allocation9], %s2022_s0, %s2022_s0, %s2023_s27  }
  0x44   :  { %2011 = dma.done.wait [#allocation3], 128  }
  0x45   :  { %2012 = vsyncadd [#allocation3], 4294967168 }
  0x46   :  { %2013 = dma.done.wait [#allocation6], 384  }
  0x47   :  { %2014 = vsyncadd [#allocation6], 4294966912 }
  0x48   :  { %2015 = dma.done.wait [#allocation9], 256  }
  0x49   :  { %2016 = vsyncadd [#allocation9], 4294967040  ;;  %v2025_v0 = vmov 0.0|0.0   ;;  %vm2026_vm0 = vmmov 0   ;;  %v2027_v1 = vmov 0.0   ;;  %vm95_vm1 = vcmask 1043456  }
  0x4a   :  { %1802 = vmatprep.subr.bf16.mxu0 %v2025_v0  ;;  %1680 = vmatprep.mubr.msk.f32.mxu0 %vm2026_vm0, %v2027_v1  ;;  %vm91_vm2 = vcmask 97280   ;;  %v82_v2 = vld [vmem:[#allocation8] sm:$0xff]  ;;  %v83_v3 = vld [vmem:[#allocation8 + $0x8] sm:$0xf]  ;;  %v558_v8 = vld [vmem:[%s2253_s6] sm:$0xff]  ;;  %vm1029_vm3 = vcmask 130048  }
  0x4b   :  { %1820 = vmatprep.subr.bf16.mxu1 %v2025_v0  ;;  %1722 = vmatprep.mubr.msk.f32.mxu1 %vm2026_vm0, %v2027_v1  ;;  %v81_v4 = vld [vmem:[#allocation5] sm:$0xff]  ;;  %v97_v5 = vsel %vm95_vm1, %v83_v3, 0  ;;  %v100_v6 = vand.u32 4294901760, %v82_v2  ;;  %v559_v9 = vld [vmem:[%s2253_s6 + $0x8] sm:$0xf]  ;;  %v564_v13 = vand.u32 4294901760, %v558_v8 }
  0x4c   :  { %v93_v7 = vsel %vm91_vm2, %v81_v4, 0  ;;  %v103_v10 = vand.u32 4294901760, %v97_v5  ;;  %v561_v12 = vsel %vm95_vm1, %v559_v9, 0  ;;  %v79_v41 = vld [vmem:[#allocation7] sm:$0xff]  ;;  %v80_v42 = vld [vmem:[#allocation7 + $0x8] sm:$0xff]  ;;  %v78_v45 = vld [vmem:[#allocation2] sm:$0xff] }
  0x4d   :  { %v2135_v11 = vand.u32 4294901760, %v93_v7  ;;  %v178_v14 = vsub.f32 %v82_v2, %v100_v6  ;;  %v567_v15 = vand.u32 4294901760, %v561_v12  ;;  %v642_v19 = vsub.f32 %v558_v8, %v564_v13  ;;  %v1616_v4 = vld [vmem:[%s2252_s5] ss:$0 sm:$0xff] }
  0x4e   :  { %v2137_v16 = vpack.c.bf16 %v103_v10, %v100_v6  ;;  %v185_v17 = vsub.f32 %v97_v5, %v103_v10  ;;  %v1034_v43 = vand.u32 4294901760, %v79_v41  ;;  %v1037_v44 = vand.u32 4294901760, %v80_v42  ;;  %v1617_v9 = vld [vmem:[%s2250_s3] ss:$0 sm:$0xff]  ;;  %s2034_s3 = smov [#allocation10]  }
  0x4f   :  { %v167_v18 = vsub.f32 %v93_v7, %v2135_v11  ;;  %v179_v20 = vand.u32 4294901760, %v178_v14  ;;  %v2140_v21 = vpack.c.bf16 %v567_v15, %v564_v13  ;;  %v649_v22 = vsub.f32 %v561_v12, %v567_v15  ;;  %s1605_s5 = sshll.u32 %s2034_s3, 4  ;;  %s1606_s5 = int_to_ptr.vmem [resolvable:$true] %s1605_s5 }
  0x50   :  { %1804 = vmatpush3.bf16.msra.mxu0 %v2137_v16  ;;  %v186_v24 = vand.u32 4294901760, %v185_v17  ;;  %v643_v25 = vand.u32 4294901760, %v642_v19  ;;  %v1809_v39 = vpack.c.bf16 %v185_v17, %v178_v14  ;;  %v1031_v47 = vsel %vm1029_vm3, %v78_v45, 0  ;;  %s1989_s8 = scalar_lea.vmem %s1606_s5, 128  ;;  %p1994_p5 = scmp.lt.s32.totalorder %s1606_s5, %s1606_s5 }
  0x51   :  { %v168_v23 = vand.u32 4294901760, %v167_v18  ;;  %1805 = vmatprep.subr.bf16.mxu0 %v2025_v0  ;;  %v180_v26 = vsub.f32 %v178_v14, %v179_v20  ;;  %1822 = vmatpush3.bf16.msra.mxu1 %v2140_v21  ;;  %v650_v27 = vand.u32 4294901760, %v649_v22  ;;  %v1827_v40 = vpack.c.bf16 %v649_v22, %v642_v19  ;;  %p1990_p4 = scmp.ne.s32.totalorder %s1606_s5, %s1989_s8  ;;  %p1995_p6 = scmp.lt.s32.totalorder %s1989_s8, %s1989_s8 }
  0x52   :  { %v187_v29 = vsub.f32 %v185_v17, %v186_v24  ;;  %1823 = vmatprep.subr.bf16.mxu1 %v2025_v0  ;;  %v644_v30 = vsub.f32 %v642_v19, %v643_v25  ;;  %v1815_v46 = vpack.c.bf16 %v186_v24, %v179_v20  ;;  %v1112_v49 = vsub.f32 %v79_v41, %v1034_v43 }
  0x53   :  { %v169_v28 = vsub.f32 %v167_v18, %v168_v23  ;;  %v181_v31 = vand.u32 4294901760, %v180_v26  ;;  %v651_v32 = vsub.f32 %v649_v22, %v650_v27  ;;  %v1833_v48 = vpack.c.bf16 %v650_v27, %v643_v25  ;;  %p1996_p7 = por %p1995_p6, %p1994_p5 }
  0x54   :  { %v188_v34 = vand.u32 4294901760, %v187_v29  ;;  %v645_v35 = vand.u32 4294901760, %v644_v30  ;;  %v1119_v50 = vsub.f32 %v80_v42, %v1037_v44  ;;  %v1100_v51 = vand.u32 4294901760, %v1031_v47 }
  0x55   :  { %v170_v33 = vand.u32 4294901760, %v169_v28  ;;  %v652_v36 = vand.u32 4294901760, %v651_v32  ;;  %v1113_v52 = vand.u32 4294901760, %v1112_v49  ;;  %v1839_v61 = vpack.c.bf16 %v1037_v44, %v1034_v43  ;;  %p1997_p8 = pnand %p1996_p7, %p1990_p4 }
  0x56   :  { %v1806_v37 = vpack.c.bf16 %v188_v34, %v181_v31  ;;  %v1120_v53 = vand.u32 4294901760, %v1119_v50  ;;  %v1101_v54 = vsub.f32 %v1031_v47, %v1100_v51  ;;  %v1845_v2 = vpack.c.bf16 %v1119_v50, %v1112_v49 }
  0x57   :  { %1681 = vmatmul.mubr.f32.vlgmr.msra.gmra.mrb[0].mxu0 %v170_v33  ;;  %1723 = vmatmul.mubr.f32.vlgmr.msra.gmra.mrb[0].mxu1 %v170_v33  ;;  %v1824_v38 = vpack.c.bf16 %v652_v36, %v645_v35  ;;  %v1114_v55 = vsub.f32 %v1112_v49, %v1113_v52  ;;  %v2030_v42 = vmov 2131351028   ;;  %v2031_v45 = vmov 2102212464  }
  0x58   :  { %1687 = vmatprep.mubr.msk.f32.mxu0 %vm2026_vm0, %v2027_v1  ;;  %1729 = vmatprep.mubr.msk.f32.mxu1 %vm2026_vm0, %v2027_v1  ;;  %v1121_v56 = vsub.f32 %v1119_v50, %v1120_v53  ;;  %v1102_v57 = vand.u32 4294901760, %v1101_v54  ;;  %v1851_v3 = vpack.c.bf16 %v1120_v53, %v1113_v52 }
  0x59   :  { %1807 = vmatpush3.bf16.msra.mxu0 %v1806_v37  ;;  %1825 = vmatpush3.bf16.msra.mxu1 %v1824_v38  ;;  %v1115_v58 = vand.u32 4294901760, %v1114_v55  ;;  %v2028_v37 = vmov 683565275  }
  0x5a   :  { %1808 = vmatprep.subr.bf16.mxu0 %v2025_v0  ;;  %1826 = vmatprep.subr.bf16.mxu1 %v2025_v0  ;;  %v1122_v59 = vand.u32 4294901760, %v1121_v56  ;;  %v1103_v60 = vsub.f32 %v1101_v54, %v1102_v57 }
  0x5c   :  { %v1842_v62 = vpack.c.bf16 %v1122_v59, %v1115_v58  ;;  %v1104_v63 = vand.u32 4294901760, %v1103_v60 }
  0x5f   :  { %1688 = vmatmul.mubr.f32.vlgmr.msra.gmra.mrb[0].mxu0 %v2135_v11  ;;  %1730 = vmatmul.mubr.f32.vlgmr.msra.gmra.mrb[0].mxu1 %v2135_v11 }
  0x60   :  { %1810 = vmatpush3.bf16.msra.mxu0 %v1809_v39  ;;  %1694 = vmatprep.mubr.msk.f32.mxu0 %vm2026_vm0, %v2027_v1  ;;  %v2029_v39 = vmov 2475754826  }
  0x61   :  { %1811 = vmatprep.subr.bf16.mxu0 %v2025_v0  ;;  %1828 = vmatpush3.bf16.msra.mxu1 %v1827_v40 }
  0x62   :  { %1736 = vmatprep.mubr.msk.f32.mxu1 %vm2026_vm0, %v2027_v1  ;;  %1829 = vmatprep.subr.bf16.mxu1 %v2025_v0 }
  0x67   :  { %1695 = vmatmul.mubr.f32.vlgmr.msra.gmra.mrb[0].mxu0 %v167_v18  ;;  %1737 = vmatmul.mubr.f32.vlgmr.msra.gmra.mrb[0].mxu1 %v167_v18 }
  0x68   :  { %1813 = vmatpush3.bf16.msra.mxu0 %v2137_v16  ;;  %1701 = vmatprep.mubr.msk.f32.mxu0 %vm2026_vm0, %v2027_v1 }
  0x69   :  { %1814 = vmatprep.subr.bf16.mxu0 %v2025_v0  ;;  %1831 = vmatpush3.bf16.msra.mxu1 %v2140_v21 }
  0x6a   :  { %1743 = vmatprep.mubr.msk.f32.mxu1 %vm2026_vm0, %v2027_v1  ;;  %1832 = vmatprep.subr.bf16.mxu1 %v2025_v0 }
  0x6f   :  { %1702 = vmatmul.mubr.f32.vlgmr.msra.gmra.mrb[0].mxu0 %v168_v23  ;;  %1744 = vmatmul.mubr.f32.vlgmr.msra.gmra.mrb[0].mxu1 %v168_v23 }
  0x70   :  { %1816 = vmatpush3.bf16.msra.mxu0 %v1815_v46  ;;  %1708 = vmatprep.mubr.msk.f32.mxu0 %vm2026_vm0, %v2027_v1 }
  0x71   :  { %1817 = vmatprep.subr.bf16.mxu0 %v2025_v0  ;;  %1834 = vmatpush3.bf16.msra.mxu1 %v1833_v48  ;;  %v2032_v48 = vmov 920167782  }
  0x72   :  { %1750 = vmatprep.mubr.msk.f32.mxu1 %vm2026_vm0, %v2027_v1  ;;  %1835 = vmatprep.subr.bf16.mxu1 %v2025_v0 }
  0x77   :  { %1709 = vmatmul.mubr.f32.vlgmr.msra.gmra.mrb[0].mxu0 %v2135_v11  ;;  %1751 = vmatmul.mubr.f32.vlgmr.msra.gmra.mrb[0].mxu1 %v2135_v11 }
  0x78   :  { %1819 = vmatpush3.bf16.msra.mxu0 %v2137_v16  ;;  %1715 = vmatprep.mubr.msk.f32.mxu0 %vm2026_vm0, %v2027_v1 }
  0x79   :  { %1837 = vmatpush3.bf16.msra.mxu1 %v2140_v21  ;;  %1757 = vmatprep.mubr.msk.f32.mxu1 %vm2026_vm0, %v2027_v1 }
  0x7a   :  { %1838 = vmatprep.subr.bf16.mxu0 %v2025_v0  ;;  %1841 = vmatprep.subr.bf16.mxu1 %v2025_v0 }
  0x7f   :  { %1716 = vmatmul.mubr.f32.vlgmr.msra.gmra.mrb[0].mxu0 %v2135_v11  ;;  %1758 = vmatmul.mubr.f32.vlgmr.msra.gmra.mrb[0].mxu1 %v2135_v11 }
  0x80   :  { %1840 = vmatpush3.bf16.msra.mxu0 %v1839_v61  ;;  %1764 = vmatprep.mubr.msk.f32.mxu0 %vm2026_vm0, %v2027_v1 }
  0x81   :  { %1843 = vmatpush3.bf16.msra.mxu1 %v1842_v62  ;;  %1844 = vmatprep.subr.bf16.mxu0 %v2025_v0 }
  0x82   :  { %1771 = vmatprep.mubr.msk.f32.mxu1 %vm2026_vm0, %v2027_v1  ;;  %1847 = vmatprep.subr.bf16.mxu1 %v2025_v0 }
  0x83   :  { %1765 = vmatmul.mubr.f32.vlgmr.msra.gmra.mrb[2].mxu0 %v1104_v63 }
  0x84   :  { %1846 = vmatpush3.bf16.msra.mxu0 %v1845_v2  ;;  %1772 = vmatmul.mubr.f32.vlgmr.msra.gmra.mrb[2].mxu1 %v1100_v51 }
  0x85   :  { %1778 = vmatprep.mubr.msk.f32.mxu0 %vm2026_vm0, %v2027_v1  ;;  %1849 = vmatpush3.bf16.msra.mxu1 %v1839_v61 }
  0x86   :  { %1850 = vmatprep.subr.bf16.mxu0 %v2025_v0  ;;  %1785 = vmatprep.mubr.msk.f32.mxu1 %vm2026_vm0, %v2027_v1 }
  0x87   :  { %1779 = vmatmul.mubr.f32.vlgmr.msra.gmra.mrb[4].mxu0 %v1101_v54  ;;  %1853 = vmatprep.subr.bf16.mxu1 %v2025_v0 }
  0x88   :  { %1852 = vmatpush3.bf16.msra.mxu0 %v1851_v3  ;;  %1786 = vmatmul.mubr.f32.vlgmr.msra.gmra.mrb[4].mxu1 %v1102_v57 }
  0x89   :  { %1792 = vmatprep.mubr.msk.f32.mxu0 %vm2026_vm0, %v2027_v1  ;;  %1855 = vmatpush3.bf16.msra.mxu1 %v1839_v61 }
  0x8a   :  { %1799 = vmatprep.mubr.msk.f32.mxu1 %vm2026_vm0, %v2027_v1 }
  0x8b   :  { %1793 = vmatmul.mubr.f32.vlgmr.msra.gmra.mrb[6].mxu0 %v1100_v51 }
  0x8c   :  { %1800 = vmatmul.mubr.f32.vlgmr.msra.gmra.mrb[6].mxu1 %v1100_v51  ;;  %v2033_v51 = vmov 1326507024  }
 0x152   :  { %v554_v5 = vpop.f32.mrb[0].mxu0  ;;  %v2205_v6 = vpop.f32.mrb[0].mxu1 }
 0x153   :  { %v2207_v7 = vadd.f32 %v1616_v4, %v554_v5  ;;  %v1717_v0 = vpop.f32.mrb[1].mxu0  ;;  %v1759_v8 = vpop.f32.mrb[1].mxu1 }
 0x155   :  { %v1495_v10 = vand.u32 2139095040, %v2207_v7  ;;  %v1492_v18 = vand.u32 2147483647, %v2207_v7  ;;  %vm1494_vm11 = vcmp.lt.s32.totalorder %v2207_v7, 0  ;;  %vm1584_vm0 = vweird.f32 %v2207_v7 }
 0x156   :  { %v1106_v1 = vpop.f32.mrb[2].mxu0 }
 0x157   :  { %v1496_v11 = vshrl.u32 %v1495_v10, 23  ;;  %v1107_v12 = vadd.f32 %v1617_v9, %v1106_v1  ;;  %v1766_v13 = vpop.f32.mrb[3].mxu0  ;;  %v1187_v14 = vpop.f32.mrb[2].mxu1  ;;  %v1499_v26 = vand.u32 8388607, %v1492_v18 }
 0x158   :  { %v1773_v17 = vpop.f32.mrb[3].mxu1  ;;  %vm1493_vm12 = vcmp.le.f32.partialorder %v1492_v18, 0.7853982 }
 0x159   :  { %v1618_v15 = vadd.s32 4294967169, %v1496_v11  ;;  %v1188_v16 = vadd.f32 %v1187_v14, %v1107_v12  ;;  %v1500_v35 = vor.u32 8388608, %v1499_v26 }
 0x15a   :  { %v1263_v19 = vpop.f32.mrb[4].mxu0 }
 0x15b   :  { %v1502_v20 = vadd.s32 1, %v1618_v15  ;;  %v1264_v21 = vadd.f32 %v1263_v19, %v1188_v16  ;;  %v1780_v22 = vpop.f32.mrb[5].mxu0  ;;  %v1338_v23 = vpop.f32.mrb[4].mxu1  ;;  %v1540_v5 = vshll.u32 %v1500_v35, 8 }
 0x15c   :  { %v1787_v24 = vpop.f32.mrb[5].mxu1 }
 0x15d   :  { %vm1503_vm4 = vcmp.gt.s32.totalorder %v1502_v20, 0  ;;  %v1339_v25 = vadd.f32 %v1338_v23, %v1264_v21 }
 0x15e   :  { %v1504_v27 = vsel %vm1503_vm4, %v1502_v20, 0  ;;  %v1415_v28 = vpop.f32.mrb[6].mxu0 }
 0x15f   :  { %v1506_v29 = vand.u32 31, %v1504_v27  ;;  %v1416_v30 = vadd.f32 %v1415_v28, %v1339_v25  ;;  %v1794_v31 = vpop.f32.mrb[7].mxu0  ;;  %v1488_v32 = vpop.f32.mrb[6].mxu1  ;;  %v1505_v36 = vshrl.u32 %v1504_v27, 5 }
 0x160   :  { %v1801_v33 = vpop.f32.mrb[7].mxu1 }
 0x161   :  { %v1507_v34 = vsub.s32 32, %v1506_v29  ;;  %v1509_v38 = vshll.u32 %v2028_v37, %v1506_v29  ;;  %v1512_v40 = vshll.u32 %v2029_v39, %v1506_v29  ;;  %v1515_v44 = vshll.u32 %v2030_v42, %v1506_v29 }
 0x162   :  { %v1518_v47 = vshll.u32 %v2031_v45, %v1506_v29  ;;  %v1521_v50 = vshll.u32 %v2032_v48, %v1506_v29  ;;  %v2216_v56 = vadd.f32 %v1488_v32, %v1416_v30  ;;  %vm1524_vm5 = vcmp.lt.s32.totalorder %v1505_v36, 1 }
 0x163   :  { %v1510_v41 = vshrl.u32 %v2029_v39, %v1507_v34  ;;  %v1513_v43 = vshrl.u32 %v2030_v42, %v1507_v34  ;;  %v1516_v46 = vshrl.u32 %v2031_v45, %v1507_v34  ;;  %v1519_v49 = vshrl.u32 %v2032_v48, %v1507_v34 }
 0x164   :  { %v1522_v52 = vshrl.u32 %v2033_v51, %v1507_v34  ;;  %vm1527_vm6 = vcmp.lt.s32.totalorder %v1505_v36, 4  ;;  %v1508_v62 = vshrl.u32 %v2028_v37, %v1507_v34  ;;  %vm1526_vm7 = vcmp.lt.s32.totalorder %v1505_v36, 3 }
 0x165   :  { %v1511_v53 = vor.u32 %v1510_v41, %v1509_v38  ;;  %v1514_v54 = vor.u32 %v1513_v43, %v1512_v40  ;;  %v1517_v55 = vor.u32 %v1516_v46, %v1515_v44  ;;  %v1520_v57 = vor.u32 %v1519_v49, %v1518_v47 }
 0x166   :  { %v1523_v58 = vor.u32 %v1522_v52, %v1521_v50  ;;  %vm1525_vm8 = vcmp.lt.s32.totalorder %v1505_v36, 2 }
 0x167   :  { %v1529_v59 = vsel %vm1527_vm6, %v1517_v55, 2102212464  ;;  %v1532_v60 = vsel %vm1524_vm5, %v1511_v53, %v1514_v54  ;;  %v1536_v61 = vsel %vm1524_vm5, %v1514_v54, %v1517_v55  ;;  %v1533_v63 = vsel %vm1527_vm6, %v1520_v57, 920167782 }
 0x168   :  { %v1537_v2 = vsel %vm1527_vm6, %v1523_v58, 1326507024  ;;  %v1534_v3 = vsel %vm1526_vm7, %v1517_v55, %v1533_v63  ;;  %v1528_v0 = vsel %vm1524_vm5, %v1508_v62, %v1511_v53  ;;  %v1530_v8 = vsel %vm1526_vm7, %v1514_v54, %v1529_v59 }
 0x169   :  { %v1538_v4 = vsel %vm1526_vm7, %v1520_v57, %v1537_v2  ;;  %v1535_v9 = vsel %vm1525_vm8, %v1532_v60, %v1534_v3  ;;  %v1531_v14 = vsel %vm1525_vm8, %v1528_v0, %v1530_v8 }
 0x16a   :  { %v1539_v10 = vsel %vm1525_vm8, %v1536_v61, %v1538_v4  ;;  %v2221_v12 = vmul.u32.u64.low %v1540_v5, %v1535_v9  ;;  %v2222_v13 = vmul.u32.u64.high %v1540_v5, %v1535_v9, %v2221_v12  ;;  %v1547_v16 = vmul.u32 %v1540_v5, %v1531_v14 }
 0x16b   :  { %v2218_v1 = vmul.u32.u64.low %v1540_v5, %v1539_v10  ;;  %v2219_v11 = vmul.u32.u64.high %v1540_v5, %v1539_v10, %v2218_v1 }
 0x16c   :  { %v1550_v15 = vadd.s32 1, %v2222_v13 }
 0x16d   :  { %vm1549_vm9 = vc.u32 %v2219_v11, %v2221_v12  ;;  %v1548_v29 = vadd.s32 %v2221_v12, %v2219_v11 }
 0x16e   :  { %v1551_v17 = vsel %vm1549_vm9, %v1550_v15, %v2222_v13 }
 0x16f   :  { %v1552_v19 = vadd.s32 %v1551_v17, %v1547_v16 }
 0x171   :  { %v1553_v20 = vadd.s32 536870912, %v1552_v19 }
 0x173   :  { %v1554_v21 = vshrl.u32 %v1553_v20, 30 }
 0x175   :  { %v1555_v22 = vshll.u32 %v1554_v21, 30  ;;  %v1578_v41 = vsub.s32 4, %v1554_v21 }
 0x177   :  { %v1556_v23 = vsub.s32 %v1552_v19, %v1555_v22  ;;  %v1579_v44 = vsel %vm1494_vm11, %v1578_v41, %v1554_v21 }
 0x178   :  { %v1581_v46 = vsel %vm1493_vm12, 0, %v1579_v44 }
 0x179   :  { %v1558_v24 = vsub.s32 0, %v1556_v23  ;;  %v1585_v47 = vadd.s32 3, %v1581_v46 }
 0x17b   :  { %v1619_v25 = vmin.u32 %v1558_v24, %v1556_v23  ;;  %v1586_v48 = vand.u32 3, %v1585_v47 }
 0x17d   :  { %v1560_v26 = vclz %v1619_v25  ;;  %vm1591_vm13 = vcmp.eq.s32.totalorder %v1586_v48, 2  ;;  %vm1588_vm14 = vcmp.eq.s32.totalorder %v1586_v48, 0  ;;  %vm1587_vm15 = vcmp.lt.s32.totalorder %v1586_v48, 2 }
 0x17f   :  { %v1620_v27 = vadd.s32 4294967294, %v1560_v26 }
 0x181   :  { %vm1621_vm10 = vcmp.lt.s32.totalorder %v1620_v27, 0 }
 0x182   :  { %v1563_v28 = vsel %vm1621_vm10, 0, %v1620_v27 }
 0x183   :  { %v1564_v30 = vsub.s32 32, %v1563_v28  ;;  %v1568_v31 = vsub.s32 4294967266, %v1563_v28  ;;  %v1565_v32 = vshll.u32 %v1556_v23, %v1563_v28 }
 0x185   :  { %v1566_v33 = vshrl.u32 %v1548_v29, %v1564_v30  ;;  %v1569_v34 = vadd.s32 127, %v1568_v31 }
 0x187   :  { %v1567_v35 = vor.u32 %v1566_v33, %v1565_v32  ;;  %v1570_v36 = vshll.u32 %v1569_v34, 23 }
 0x189   :  { %v1571_v37 = vor.u32 4788187, %v1570_v36  ;;  %v1574_v39 = vcvt.s32.f32 %v1567_v35 }
 0x18b   :  { %v1572_v38 = vand.u32 2147483647, %v1571_v37 }
 0x18d   :  { %v1575_v40 = vmul.f32 %v1574_v39, %v1572_v38 }
 0x18f   :  { %v1576_v42 = vxor.u32 2147483648, %v1575_v40 }
 0x191   :  { %v1577_v43 = vsel %vm1494_vm11, %v1576_v42, %v1575_v40 }
 0x192   :  { %v1580_v45 = vsel %vm1493_vm12, %v2207_v7, %v1577_v43 }
 0x193   :  { %1897 = vcosq.f32 %v1580_v45 }
 0x194   :  { %1899 = vsinq.f32 %v1580_v45 }
 0x19d   :  { %v1898_v49 = vpop.eup %1897 }
 0x19e   :  { %v1900_v50 = vpop.eup %1899  ;;  %v1592_v51 = vxor.u32 2147483648, %v1898_v49 }
 0x19f   :  { %v1589_v52 = vxor.u32 2147483648, %v1900_v50 }
 0x1a0   :  { %v1593_v53 = vsel %vm1591_vm13, %v1592_v51, %v1900_v50 }
 0x1a1   :  { %v1590_v54 = vsel %vm1588_vm14, %v1898_v49, %v1589_v52 }
 0x1a2   :  { %v1594_v18 = vsel %vm1587_vm15, %v1590_v54, %v1593_v53 }
 0x1a3   :  { %v1595_v55 = vsel %vm1584_vm0, nan, %v1594_v18 }
 0x1a4   :  { %v1596_v57 = vadd.f32 %v1595_v55, %v2216_v56 }
 0x1a6   :  { %v1597_v58 = vmul.f32 %v1596_v57, %v2205_v6 }
 0x1a8   :  { %1598 = vst [vmem:[#allocation10] sm:$0xff] %v1597_v58 }
 0x1a9   :  { %2000 = shalt.err (!%p1997_p8)
}
 0x1aa   :  { %s2001_s11 = scalar_lea.hbm %s2254_s7, 128 }
 0x1ab   :  { %p2002_p9 = scmp.ne.s32.totalorder %s2254_s7, %s2001_s11  ;;  %p2005_p10 = scmp.lt.u32.totalorder %s2001_s11, %s2254_s7 }
 0x1ad   :  { %p2007_p11 = pnand %p2005_p10, %p2002_p9 }
 0x1af   :  { %2010 = shalt.err (!%p2007_p11)
}
 0x1b0   :  { %1608 = dma.vmem_to_hbm [thread:$0]  %s1606_s5, 128, %s2254_s7, [#allocation4]  }
 0x1b1   :  { %2017 = dma.done.wait [#allocation4], 128  }
 0x1b2   :  { %2018 = vsyncadd [#allocation4], 4294967168 }
 0x1b3   :  { %1612 = vsyncpa [#allocation3], 1 }
 0x1b4   :  { %1613 = vsyncpa [#allocation6], 1 }
 0x1b5   :  { %1614 = vsyncpa [#allocation9], 1 }
 0x1b6   :  { %1615 = vsyncpa [#allocation4], 1 }

</bundles_post_ra>
